<compile_context>
chip_gen: v5e
topology: v5e:2x2
jax: 0.10.0
libtpu: 0.0.40
codegen_flags: <defaults>
</compile_context>

<pallas_src>
import functools

import jax
import jax.numpy as jnp
from jax.experimental import pallas as pl
from jax.experimental.pallas import tpu as pltpu


def _sine_kernel(x_ref, o_ref, *, w0):
    # Pointwise: y = sin(w0 * x), computed in f32, stored in the output dtype.
    x = x_ref[...].astype(jnp.float32)
    o_ref[...] = jnp.sin(w0 * x).astype(o_ref.dtype)


_LANE_CHOICES = (2048, 1024, 512, 256, 128)
_TARGET_BLOCK_BYTES = 2 * 1024 * 1024  # ~2 MiB/block


def _layout_plan(n, itemsize):
    """Pick a lane-dense (rows, cols) reshape and a row-tile size."""
    pad = (-n) % 128
    n_pad = n + pad
    cols = 128
    for c in _LANE_CHOICES:
        if n_pad % c == 0:
            cols = c
            break
    rows = n_pad // cols

    # Row tile sized to ~2 MiB per block.
    tile_r = max(1, _TARGET_BLOCK_BYTES // (cols * itemsize))
    if tile_r >= rows:
        tile_r = rows  # full dim: always a legal block shape
    else:
        # keep the sublane dim aligned for the dtype's packing
        sub = 8 if itemsize >= 4 else (16 if itemsize == 2 else 32)
        tile_r = max(sub, (tile_r // sub) * sub)
        tile_r = min(tile_r, rows)
    return pad, rows, cols, tile_r


@functools.partial(jax.jit, static_argnames=("w0",))
def sine(x, w0=1.0):
    """Elementwise sin(w0 * x) via a Pallas TPU kernel (matches torch Sine)."""
    orig_shape = x.shape
    orig_dtype = x.dtype

    n = x.size
    if n == 0:
        return x

    pad, rows, cols, tile_r = _layout_plan(n, jnp.dtype(orig_dtype).itemsize)

    flat = x.reshape(-1)
    if pad:
        # Only the small flat remainder is padded (not whole rows).
        flat = jnp.pad(flat, (0, pad))
    x2 = flat.reshape(rows, cols)  # lane-dense: cols is a multiple of 128

    grid = (pl.cdiv(rows, tile_r),)

    out2 = pl.pallas_call(
        functools.partial(_sine_kernel, w0=float(w0)),
        out_shape=jax.ShapeDtypeStruct((rows, cols), orig_dtype),
        grid=grid,
        in_specs=[pl.BlockSpec((tile_r, cols), lambda i: (i, 0))],
        out_specs=pl.BlockSpec((tile_r, cols), lambda i: (i, 0)),
        compiler_params=pltpu.CompilerParams(
            dimension_semantics=("parallel",),
        ),
    )(x2)

    out_flat = out2.reshape(-1)
    if pad:
        out_flat = out_flat[:n]
    return out_flat.reshape(orig_shape)


if __name__ == "__main__":
    key = jax.random.PRNGKey(0)
    # NCHW activations, same convention as the PyTorch module usage.
    x = jax.random.normal(key, (2, 4, 16, 16), dtype=jnp.float32)
    w0 = 30.0  # SIREN-style frequency; module default is 1.0, any w0 works.

    y = sine(x, w0=w0)
    y = jax.block_until_ready(y)

    # Correctness check against plain JAX reference (f32).
    y_ref = jnp.sin(w0 * x)
    assert y.shape == x.shape and y.dtype == x.dtype
    assert jnp.max(jnp.abs(y - y_ref)) < 1e-5

    # Exercise the narrow-dtype path (explicit f32 compute + cast-back).
    x_bf16 = x.astype(jnp.bfloat16)
    y_bf16 = jax.block_until_ready(sine(x_bf16, w0=w0))
    y_bf16_ref = jnp.sin(w0 * x_bf16.astype(jnp.float32)).astype(jnp.bfloat16)
    assert y_bf16.shape == x.shape and y_bf16.dtype == jnp.bfloat16
    assert jnp.max(jnp.abs(y_bf16.astype(jnp.float32)
                           - y_bf16_ref.astype(jnp.float32))) < 0.05

    print("KERNEL_OK")
</pallas_src>

<mosaic_0001>
module attributes {stable_mosaic.version = 11 : i64} {
  func.func @_sine_kernel(%arg0: i32, %arg1: memref<1x2048xf32, #tpu.memory_space<vmem>>, %arg2: memref<1x2048xf32, #tpu.memory_space<vmem>>) attributes {dimension_semantics = [#tpu.dimension_semantics<parallel>], iteration_bounds = array<i64: 1>, scalar_prefetch = 0 : i64, scratch_operands = 0 : i64, tpu.core_type = #tpu.core_type<tc>, window_params = [{transform_indices = @transform_0, window_bounds = array<i64: 1, 2048>}, {transform_indices = @transform_1, window_bounds = array<i64: 1, 2048>}]} {
    %c0 = arith.constant 0 : index
    %c0_0 = arith.constant 0 : index
    %0 = vector.load %arg1[%c0, %c0_0] : memref<1x2048xf32, #tpu.memory_space<vmem>>, vector<1x2048xf32>
    %cst = arith.constant 3.000000e+01 : f32
    %1 = vector.broadcast %cst : f32 to vector<1x2048xf32>
    %2 = arith.mulf %1, %0 : vector<1x2048xf32>
    %3 = math.sin %2 : vector<1x2048xf32>
    %c0_1 = arith.constant 0 : index
    %c0_2 = arith.constant 0 : index
    %4 = vector.load %arg2[%c0_1, %c0_2] : memref<1x2048xf32, #tpu.memory_space<vmem>>, vector<1x2048xf32>
    tpu.vector_store %arg2[%c0_1, %c0_2], %3 {strides = array<i32>} : memref<1x2048xf32, #tpu.memory_space<vmem>>, vector<1x2048xf32>,
    return
  }
  func.func @transform_0(%arg0: i32) -> (i32, i32) {
    %c0_i32 = arith.constant 0 : i32
    %c0_i32_0 = arith.constant 0 : i32
    return %arg0, %c0_i32 : i32, i32
  }
  func.func @transform_1(%arg0: i32) -> (i32, i32) {
    %c0_i32 = arith.constant 0 : i32
    %c0_i32_0 = arith.constant 0 : i32
    return %arg0, %c0_i32 : i32, i32
  }
}

</mosaic_0001>

<bundles_post_ra>
// kernel: sine.1
= control target key start
LH: loop header
LB: loop body
LE: loop exit
PB: predicated region body
PF: predicated region fallthrough
CT: control target
= control target key end

     0   :  { %v341_v25 = vmov 683565275   ;;  %v342_v27 = vmov 2475754826   ;;  %v343_v29 = vmov 2131351028   ;;  %s543_s0 = inlined_call_operand.vmem [shape: f32[1,2048], index: 0, kind: input, shape index: {}]   ;;  %s544_s1 = inlined_call_operand.vmem [shape: f32[1,2048], index: 1, kind: output, shape index: {}]  }
   0x1   :  { %v8_v0 = vld [vmem:[%s543_s0] sm:$0xff]  ;;  %v9_v1 = vld [vmem:[%s543_s0 + $0x8] sm:$0xff]  ;;  %v344_v31 = vmov 2102212464   ;;  %v345_v33 = vmov 920167782  }
   0x2   :  { %v364_v2 = vmul.f32 30.0, %v8_v0  ;;  %v366_v3 = vmul.f32 30.0, %v9_v1  ;;  %v346_v42 = vmov 1326507024  }
   0x4   :  { %v12_v4 = vand.u32 2147483647, %v364_v2  ;;  %v15_v5 = vand.u32 2139095040, %v364_v2  ;;  %v167_v6 = vand.u32 2147483647, %v366_v3  ;;  %v170_v7 = vand.u32 2139095040, %v366_v3 }
   0x6   :  { %v16_v8 = vshrl.u32 %v15_v5, 23  ;;  %v19_v9 = vand.u32 8388607, %v12_v4  ;;  %v171_v10 = vshrl.u32 %v170_v7, 23  ;;  %v174_v14 = vand.u32 8388607, %v167_v6 }
   0x8   :  { %v328_v11 = vadd.s32 4294967169, %v16_v8  ;;  %v20_v12 = vor.u32 8388608, %v19_v9  ;;  %v331_v13 = vadd.s32 4294967169, %v171_v10  ;;  %v175_v19 = vor.u32 8388608, %v174_v14 }
   0xa   :  { %v22_v15 = vadd.s32 1, %v328_v11  ;;  %v177_v16 = vadd.s32 1, %v331_v13  ;;  %v376_v18 = vshll.u32 %v20_v12, 8  ;;  %v386_v36 = vshll.u32 %v175_v19, 8 }
   0xc   :  { %vm23_vm0 = vcmp.gt.s32.totalorder %v22_v15, 0  ;;  %vm178_vm1 = vcmp.gt.s32.totalorder %v177_v16, 0  ;;  %v61_v35 = vand.u32 65535, %v376_v18  ;;  %v62_v40 = vshrl.u32 %v376_v18, 16 }
   0xd   :  { %v24_v17 = vsel %vm23_vm0, %v22_v15, 0  ;;  %v179_v21 = vsel %vm178_vm1, %v177_v16, 0 }
   0xe   :  { %v26_v20 = vand.u32 31, %v24_v17  ;;  %v378_v22 = vshrl.u32 %v24_v17, 5  ;;  %v380_v23 = vand.u32 31, %v179_v21  ;;  %v404_v53 = vshrl.u32 %v179_v21, 5 }
  0x10   :  { %v27_v24 = vsub.s32 32, %v26_v20  ;;  %v29_v26 = vshll.u32 %v341_v25, %v26_v20  ;;  %v32_v28 = vshll.u32 %v342_v27, %v26_v20  ;;  %v35_v30 = vshll.u32 %v343_v29, %v26_v20 }
  0x11   :  { %v38_v32 = vshll.u32 %v344_v31, %v26_v20  ;;  %v41_v34 = vshll.u32 %v345_v33, %v26_v20  ;;  %vm44_vm2 = vcmp.lt.s32.totalorder %v378_v22, 1  ;;  %vm47_vm3 = vcmp.lt.s32.totalorder %v378_v22, 4 }
  0x12   :  { %v30_v37 = vshrl.u32 %v342_v27, %v27_v24  ;;  %v33_v38 = vshrl.u32 %v343_v29, %v27_v24  ;;  %v36_v39 = vshrl.u32 %v344_v31, %v27_v24  ;;  %v39_v41 = vshrl.u32 %v345_v33, %v27_v24 }
  0x13   :  { %v42_v43 = vshrl.u32 %v346_v42, %v27_v24  ;;  %v395_v47 = vsub.s32 32, %v380_v23  ;;  %v28_v48 = vshrl.u32 %v341_v25, %v27_v24  ;;  %vm46_vm4 = vcmp.lt.s32.totalorder %v378_v22, 3 }
  0x14   :  { %v31_v44 = vor.u32 %v30_v37, %v29_v26  ;;  %v34_v45 = vor.u32 %v33_v38, %v32_v28  ;;  %v37_v46 = vor.u32 %v36_v39, %v35_v30  ;;  %v40_v49 = vor.u32 %v39_v41, %v38_v32 }
  0x15   :  { %v43_v50 = vor.u32 %v42_v43, %v41_v34  ;;  %vm45_vm5 = vcmp.lt.s32.totalorder %v378_v22, 2  ;;  %v184_v56 = vshll.u32 %v341_v25, %v380_v23  ;;  %v187_v57 = vshll.u32 %v342_v27, %v380_v23 }
  0x16   :  { %v52_v51 = vsel %vm44_vm2, %v31_v44, %v34_v45  ;;  %v56_v52 = vsel %vm44_vm2, %v34_v45, %v37_v46  ;;  %v53_v54 = vsel %vm47_vm3, %v40_v49, 920167782  ;;  %v49_v58 = vsel %vm47_vm3, %v37_v46, 2102212464 }
  0x17   :  { %v57_v55 = vsel %vm47_vm3, %v43_v50, 1326507024  ;;  %v54_v59 = vsel %vm46_vm4, %v37_v46, %v53_v54  ;;  %v185_v61 = vshrl.u32 %v342_v27, %v395_v47  ;;  %v48_v62 = vsel %vm44_vm2, %v28_v48, %v31_v44 }
  0x18   :  { %v58_v60 = vsel %vm46_vm4, %v40_v49, %v57_v55  ;;  %v55_v63 = vsel %vm45_vm5, %v52_v51, %v54_v59  ;;  %v188_v1 = vshrl.u32 %v343_v29, %v395_v47  ;;  %v50_v10 = vsel %vm46_vm4, %v34_v45, %v49_v58 }
  0x19   :  { %v59_v0 = vsel %vm45_vm5, %v56_v52, %v58_v60  ;;  %v85_v8 = vand.u32 65535, %v55_v63  ;;  %v86_v9 = vshrl.u32 %v55_v63, 16  ;;  %v429_v11 = vor.u32 %v185_v61, %v184_v56 }
  0x1a   :  { %v63_v5 = vand.u32 65535, %v59_v0  ;;  %v64_v7 = vshrl.u32 %v59_v0, 16  ;;  %v431_v12 = vor.u32 %v188_v1, %v187_v57  ;;  %v190_v13 = vshll.u32 %v343_v29, %v380_v23 }
  0x1b   :  { %v191_v17 = vshrl.u32 %v344_v31, %v395_v47  ;;  %v87_v20 = vmul.u32 %v85_v8, %v61_v35  ;;  %v88_v21 = vmul.u32 %v86_v9, %v61_v35  ;;  %v89_v24 = vmul.u32 %v85_v8, %v62_v40 }
  0x1c   :  { %v65_v14 = vmul.u32 %v63_v5, %v61_v35  ;;  %v66_v15 = vmul.u32 %v64_v7, %v61_v35  ;;  %v67_v16 = vmul.u32 %v63_v5, %v62_v40  ;;  %v68_v19 = vmul.u32 %v64_v7, %v62_v40 }
  0x1d   :  { %v90_v30 = vmul.u32 %v86_v9, %v62_v40  ;;  %v91_v34 = vshll.u32 %v88_v21, 16  ;;  %v92_v37 = vshrl.u32 %v88_v21, 16  ;;  %v93_v38 = vshll.u32 %v89_v24, 16 }
  0x1e   :  { %v69_v26 = vshll.u32 %v66_v15, 16  ;;  %v70_v27 = vshrl.u32 %v66_v15, 16  ;;  %v71_v28 = vshll.u32 %v67_v16, 16  ;;  %v72_v32 = vshrl.u32 %v67_v16, 16 }
  0x1f   :  { %v94_v39 = vshrl.u32 %v89_v24, 16  ;;  %v193_v41 = vshll.u32 %v344_v31, %v380_v23  ;;  %v347_v43 = vmov 0   ;;  %vm95_vm7 = vc.u32 %v87_v20, %v91_v34 }
  0x20   :  { %vm73_vm6 = vc.u32 %v65_v14, %v69_v26  ;;  %v75_v29 = vadd.s32 %v69_v26, %v65_v14  ;;  %v97_v35 = vadd.s32 %v91_v34, %v87_v20  ;;  %v194_v45 = vshrl.u32 %v345_v33, %v395_v47 }
  0x21   :  { %v74_v44 = vsel %vm73_vm6, 1, %v347_v43  ;;  %v96_v40 = vsel %vm95_vm7, 1, %v347_v43  ;;  %v196_v48 = vshll.u32 %v345_v33, %v380_v23  ;;  %v192_v31 = vor.u32 %v191_v17, %v190_v13 }
  0x22   :  { %v76_v46 = vadd.s32 %v74_v44, %v68_v19  ;;  %vm77_vm8 = vc.u32 %v75_v29, %v71_v28  ;;  %v98_v50 = vadd.s32 %v96_v40, %v90_v30  ;;  %vm99_vm9 = vc.u32 %v97_v35, %v93_v38 }
  0x23   :  { %v78_v49 = vsel %vm77_vm8, 1, %v347_v43  ;;  %v100_v52 = vsel %vm99_vm9, 1, %v347_v43  ;;  %v195_v54 = vor.u32 %v194_v45, %v193_v41  ;;  %v197_v55 = vshrl.u32 %v346_v42, %v395_v47 }
  0x24   :  { %v80_v51 = vadd.s32 %v78_v49, %v76_v46  ;;  %v448_v56 = vadd.s32 %v97_v35, %v93_v38  ;;  %v102_v57 = vadd.s32 %v100_v52, %v98_v50  ;;  %vm199_vm10 = vcmp.lt.s32.totalorder %v404_v53, 1 }
  0x25   :  { %vm201_vm11 = vcmp.lt.s32.totalorder %v404_v53, 3  ;;  %v198_v33 = vor.u32 %v197_v55, %v196_v48  ;;  %vm200_vm12 = vcmp.lt.s32.totalorder %v404_v53, 2  ;;  %vm202_vm13 = vcmp.lt.s32.totalorder %v404_v53, 4 }
  0x26   :  { %v81_v23 = vadd.s32 %v80_v51, %v70_v27  ;;  %v51_v58 = vsel %vm45_vm5, %v48_v62, %v50_v10  ;;  %v103_v59 = vadd.s32 %v102_v57, %v92_v37  ;;  %v207_v42 = vsel %vm199_vm10, %v429_v11, %v431_v12 }
  0x27   :  { %v208_v60 = vsel %vm202_vm13, %v195_v54, 920167782  ;;  %v211_v0 = vsel %vm199_vm10, %v431_v12, %v192_v31  ;;  %v216_v22 = vand.u32 65535, %v386_v36  ;;  %v212_v5 = vsel %vm202_vm13, %v198_v33, 1326507024 }
  0x28   :  { %v462_v61 = vadd.s32 %v81_v23, %v72_v32  ;;  %v209_v63 = vsel %vm201_vm11, %v192_v31, %v208_v60  ;;  %v104_v62 = vadd.s32 %v103_v59, %v94_v39  ;;  %v217_v7 = vshrl.u32 %v386_v36, 16 }
  0x29   :  { %v210_v1 = vsel %vm200_vm12, %v207_v42, %v209_v63  ;;  %v105_v8 = vmul.u32 %v376_v18, %v51_v58  ;;  %v213_v9 = vsel %vm201_vm11, %v195_v54, %v212_v5  ;;  %v183_v20 = vshrl.u32 %v341_v25, %v395_v47 }
  0x2a   :  { %vm107_vm14 = vc.u32 %v462_v61, %v448_v56  ;;  %v240_v10 = vand.u32 65535, %v210_v1  ;;  %v108_v13 = vadd.s32 1, %v104_v62  ;;  %v214_v14 = vsel %vm200_vm12, %v211_v0, %v213_v9 }
  0x2b   :  { %v241_v15 = vshrl.u32 %v210_v1, 16  ;;  %v218_v16 = vand.u32 65535, %v214_v14  ;;  %v219_v17 = vshrl.u32 %v214_v14, 16  ;;  %v204_v37 = vsel %vm202_vm13, %v192_v31, 2102212464 }
  0x2c   :  { %v109_v19 = vsel %vm107_vm14, %v108_v13, %v104_v62  ;;  %v244_v18 = vmul.u32 %v240_v10, %v217_v7  ;;  %v242_v28 = vmul.u32 %v240_v10, %v216_v22  ;;  %v203_v39 = vsel %vm199_vm10, %v183_v20, %v429_v11 }
  0x2d   :  { %v243_v21 = vmul.u32 %v241_v15, %v216_v22  ;;  %v110_v24 = vadd.s32 %v109_v19, %v105_v8  ;;  %v220_v26 = vmul.u32 %v218_v16, %v216_v22  ;;  %v221_v27 = vmul.u32 %v219_v17, %v216_v22 }
  0x2e   :  { %v222_v30 = vmul.u32 %v218_v16, %v217_v7  ;;  %v223_v38 = vmul.u32 %v219_v17, %v217_v7  ;;  %v245_v25 = vmul.u32 %v241_v15, %v217_v7  ;;  %v248_v47 = vshll.u32 %v244_v18, 16 }
  0x2f   :  { %v246_v32 = vshll.u32 %v243_v21, 16  ;;  %v111_v34 = vadd.s32 536870912, %v110_v24  ;;  %v224_v29 = vshll.u32 %v221_v27, 16  ;;  %v205_v45 = vsel %vm201_vm11, %v431_v12, %v204_v37 }
  0x30   :  { %v226_v41 = vshll.u32 %v222_v30, 16  ;;  %v225_v11 = vshrl.u32 %v221_v27, 16  ;;  %v247_v51 = vshrl.u32 %v243_v21, 16  ;;  %v227_v55 = vshrl.u32 %v222_v30, 16 }
  0x31   :  { %v489_v44 = vshrl.u32 %v111_v34, 30  ;;  %vm228_vm15 = vc.u32 %v220_v26, %v224_v29  ;;  %v230_v35 = vadd.s32 %v224_v29, %v220_v26  ;;  %vm250_vm0 = vc.u32 %v242_v28, %v246_v32 }
  0x32   :  { %v229_v46 = vsel %vm228_vm15, 1, %v347_v43  ;;  %v251_v40 = vsel %vm250_vm0, 1, %v347_v43  ;;  %v252_v48 = vadd.s32 %v246_v32, %v242_v28  ;;  %v249_v23 = vshrl.u32 %v244_v18, 16 }
  0x33   :  { %v113_v49 = vshll.u32 %v489_v44, 30  ;;  %v231_v50 = vadd.s32 %v229_v46, %v223_v38  ;;  %vm232_vm1 = vc.u32 %v230_v35, %v226_v41  ;;  %v253_v52 = vadd.s32 %v251_v40, %v245_v25 }
  0x34   :  { %v233_v31 = vsel %vm232_vm1, 1, %v347_v43  ;;  %vm254_vm2 = vc.u32 %v252_v48, %v248_v47  ;;  %v256_v42 = vadd.s32 %v252_v48, %v248_v47  ;;  %v206_v60 = vsel %vm200_vm12, %v203_v39, %v205_v45 }
  0x35   :  { %v114_v54 = vsub.s32 %v110_v24, %v113_v49  ;;  %v235_v57 = vadd.s32 %v233_v31, %v231_v50  ;;  %v255_v12 = vsel %vm254_vm2, 1, %v347_v43  ;;  %v260_v5 = vmul.u32 %v386_v36, %v206_v60 }
  0x36   :  { %v257_v33 = vadd.s32 %v255_v12, %v253_v52  ;;  %v106_v43 = vadd.s32 %v448_v56, %v462_v61  ;;  %v136_v30 = vsub.s32 4, %v489_v44  ;;  %vm14_vm7 = vcmp.lt.s32.totalorder %v364_v2, 0 }
  0x37   :  { %vm115_vm3 = vcmp.lt.s32.totalorder %v114_v54, 0  ;;  %v116_v58 = vsub.s32 0, %v114_v54  ;;  %v236_v59 = vadd.s32 %v235_v57, %v225_v11  ;;  %vm511_vm8 = vcmp.le.f32.partialorder %v12_v4, 0.7853982 }
  0x38   :  { %v258_v63 = vadd.s32 %v257_v33, %v247_v51  ;;  %v137_v39 = vsel %vm14_vm7, %v136_v30, %v489_v44  ;;  %vm169_vm11 = vcmp.lt.s32.totalorder %v366_v3, 0  ;;  %vm525_vm13 = vcmp.le.f32.partialorder %v167_v6, 0.7853982 }
  0x39   :  { %v117_v0 = vsel %vm115_vm3, %v116_v58, %v114_v54  ;;  %v237_v22 = vadd.s32 %v236_v59, %v227_v55  ;;  %v139_v45 = vsel %vm511_vm8, 0, %v137_v39  ;;  %vm155_vm15 = vweird.f32 %v364_v2 }
  0x3a   :  { %v118_v62 = vclz %v117_v0  ;;  %v259_v1 = vadd.s32 %v258_v63, %v249_v23  ;;  %v156_v51 = vadd.s32 3, %v139_v45  ;;  %vm310_vm3 = vweird.f32 %v366_v3 }
  0x3b   :  { %vm262_vm4 = vc.u32 %v237_v22, %v256_v42  ;;  %v261_v35 = vadd.s32 %v256_v42, %v237_v22 }
  0x3c   :  { %v329_v7 = vadd.s32 4294967294, %v118_v62  ;;  %v263_v8 = vadd.s32 1, %v259_v1  ;;  %v157_v58 = vand.u32 3, %v156_v51 }
  0x3e   :  { %vm330_vm5 = vcmp.lt.s32.totalorder %v329_v7, 0  ;;  %v264_v9 = vsel %vm262_vm4, %v263_v8, %v259_v1  ;;  %vm162_vm10 = vcmp.eq.s32.totalorder %v157_v58, 2  ;;  %vm159_vm12 = vcmp.eq.s32.totalorder %v157_v58, 0 }
  0x3f   :  { %v121_v10 = vsel %vm330_vm5, 0, %v329_v7  ;;  %v265_v13 = vadd.s32 %v264_v9, %v260_v5  ;;  %vm158_vm14 = vcmp.lt.s32.totalorder %v157_v58, 2 }
  0x40   :  { %v122_v14 = vsub.s32 32, %v121_v10  ;;  %v123_v53 = vshll.u32 %v114_v54, %v121_v10  ;;  %v126_v15 = vsub.s32 4294967266, %v121_v10 }
  0x41   :  { %v266_v16 = vadd.s32 536870912, %v265_v13 }
  0x42   :  { %v124_v17 = vshrl.u32 %v106_v43, %v122_v14  ;;  %v127_v19 = vadd.s32 127, %v126_v15 }
  0x43   :  { %v504_v20 = vshrl.u32 %v266_v16, 30 }
  0x44   :  { %v125_v21 = vor.u32 %v124_v17, %v123_v53  ;;  %v128_v36 = vshll.u32 %v127_v19, 23 }
  0x45   :  { %v268_v18 = vshll.u32 %v504_v20, 30  ;;  %v291_v8 = vsub.s32 4, %v504_v20 }
  0x46   :  { %v129_v24 = vor.u32 4788187, %v128_v36  ;;  %v132_v26 = vcvt.s32.f32 %v125_v21 }
  0x47   :  { %v269_v27 = vsub.s32 %v265_v13, %v268_v18  ;;  %v292_v15 = vsel %vm169_vm11, %v291_v8, %v504_v20 }
  0x48   :  { %v130_v56 = vand.u32 2147483647, %v129_v24  ;;  %v294_v21 = vsel %vm525_vm13, 0, %v292_v15 }
  0x49   :  { %vm270_vm6 = vcmp.lt.s32.totalorder %v269_v27, 0  ;;  %v271_v61 = vsub.s32 0, %v269_v27 }
  0x4a   :  { %v133_v28 = vmul.f32 %v132_v26, %v130_v56  ;;  %v311_v26 = vadd.s32 3, %v294_v21 }
  0x4b   :  { %v272_v32 = vsel %vm270_vm6, %v271_v61, %v269_v27 }
  0x4c   :  { %v134_v37 = vxor.u32 2147483648, %v133_v28  ;;  %v273_v38 = vclz %v272_v32 }
  0x4e   :  { %v135_v29 = vsel %vm14_vm7, %v134_v37, %v133_v28  ;;  %v332_v41 = vadd.s32 4294967294, %v273_v38  ;;  %v312_v28 = vand.u32 3, %v311_v26 }
  0x4f   :  { %v138_v25 = vsel %vm511_vm8, %v364_v2, %v135_v29 }
  0x50   :  { %v140_v47 = vmul.f32 %v138_v25, %v138_v25  ;;  %vm333_vm9 = vcmp.lt.s32.totalorder %v332_v41, 0  ;;  %vm317_vm0 = vcmp.eq.s32.totalorder %v312_v28, 2  ;;  %vm314_vm1 = vcmp.eq.s32.totalorder %v312_v28, 0 }
  0x51   :  { %v276_v4 = vsel %vm333_vm9, 0, %v332_v41  ;;  %vm313_vm2 = vcmp.lt.s32.totalorder %v312_v28, 2 }
  0x52   :  { %v141_v46 = vmul.f32 -0.001358992, %v140_v47  ;;  %v148_v40 = vmul.f32 -0.00019511016, %v140_v47  ;;  %v277_v48 = vsub.s32 32, %v276_v4  ;;  %v278_v49 = vshll.u32 %v269_v27, %v276_v4 }
  0x53   :  { %v281_v11 = vsub.s32 4294967266, %v276_v4 }
  0x54   :  { %v142_v50 = vadd.f32 0.041655596, %v141_v46  ;;  %v149_v31 = vadd.f32 0.008332121, %v148_v40  ;;  %v279_v44 = vshrl.u32 %v261_v35, %v277_v48 }
  0x55   :  { %v282_v52 = vadd.s32 127, %v281_v11 }
  0x56   :  { %v143_v54 = vmul.f32 %v142_v50, %v140_v47  ;;  %v150_v55 = vmul.f32 %v149_v31, %v140_v47  ;;  %v280_v57 = vor.u32 %v279_v44, %v278_v49 }
  0x57   :  { %v283_v12 = vshll.u32 %v282_v52, 23 }
  0x58   :  { %v144_v23 = vadd.f32 -0.4999988, %v143_v54  ;;  %v151_v33 = vadd.f32 -0.16666654, %v150_v55  ;;  %v287_v42 = vcvt.s32.f32 %v280_v57 }
  0x59   :  { %v284_v59 = vor.u32 4788187, %v283_v12 }
  0x5a   :  { %v145_v60 = vmul.f32 %v144_v23, %v140_v47  ;;  %v152_v63 = vmul.f32 %v151_v33, %v140_v47 }
  0x5b   :  { %v285_v0 = vand.u32 2147483647, %v284_v59 }
  0x5c   :  { %v146_v22 = vadd.f32 1.0, %v145_v60  ;;  %v153_v62 = vadd.f32 1.0, %v152_v63 }
  0x5d   :  { %v288_v1 = vmul.f32 %v287_v42, %v285_v0 }
  0x5e   :  { %v154_v5 = vmul.f32 %v153_v62, %v138_v25  ;;  %v163_v7 = vxor.u32 2147483648, %v146_v22 }
  0x5f   :  { %v289_v9 = vxor.u32 2147483648, %v288_v1 }
  0x60   :  { %v160_v10 = vxor.u32 2147483648, %v154_v5  ;;  %v164_v13 = vsel %vm162_vm10, %v163_v7, %v154_v5 }
  0x61   :  { %v290_v14 = vsel %vm169_vm11, %v289_v9, %v288_v1 }
  0x62   :  { %v161_v53 = vsel %vm159_vm12, %v146_v22, %v160_v10  ;;  %v293_v16 = vsel %vm525_vm13, %v366_v3, %v290_v14 }
  0x63   :  { %v165_v17 = vsel %vm158_vm14, %v161_v53, %v164_v13  ;;  %v295_v19 = vmul.f32 %v293_v16, %v293_v16 }
  0x64   :  { %v166_v6 = vsel %vm155_vm15, nan, %v165_v17 }
  0x65   :  { %v296_v36 = vmul.f32 -0.001358992, %v295_v19  ;;  %v303_v18 = vmul.f32 -0.00019511016, %v295_v19  ;;  %322 = vst [vmem:[%s544_s1] sm:$0xff] %v166_v6 }
  0x67   :  { %v297_v2 = vadd.f32 0.041655596, %v296_v36  ;;  %v304_v24 = vadd.f32 0.008332121, %v303_v18 }
  0x69   :  { %v298_v20 = vmul.f32 %v297_v2, %v295_v19  ;;  %v305_v27 = vmul.f32 %v304_v24, %v295_v19 }
  0x6b   :  { %v299_v56 = vadd.f32 -0.4999988, %v298_v20  ;;  %v306_v61 = vadd.f32 -0.16666654, %v305_v27 }
  0x6d   :  { %v300_v30 = vmul.f32 %v299_v56, %v295_v19  ;;  %v307_v32 = vmul.f32 %v306_v61, %v295_v19 }
  0x6f   :  { %v301_v34 = vadd.f32 1.0, %v300_v30  ;;  %v308_v37 = vadd.f32 1.0, %v307_v32 }
  0x71   :  { %v309_v38 = vmul.f32 %v308_v37, %v293_v16  ;;  %v318_v29 = vxor.u32 2147483648, %v301_v34 }
  0x73   :  { %v315_v39 = vxor.u32 2147483648, %v309_v38  ;;  %v319_v41 = vsel %vm317_vm0, %v318_v29, %v309_v38 }
  0x75   :  { %v316_v25 = vsel %vm314_vm1, %v301_v34, %v315_v39 }
  0x76   :  { %v320_v47 = vsel %vm313_vm2, %v316_v25, %v319_v41 }
  0x77   :  { %v321_v35 = vsel %vm310_vm3, nan, %v320_v47 }
  0x78   :  { %323 = vst [vmem:[%s544_s1 + $0x8] sm:$0xff] %v321_v35 }

</bundles_post_ra>
